<compile_context>
chip_gen: v6e
topology: v6e:2x2x1
jax: 0.10.0
libtpu: 0.0.40
codegen_flags: <defaults>
</compile_context>

<pallas_src>
import functools

import jax
import jax.numpy as jnp
import numpy as np
from jax.experimental import pallas as pl
from jax.experimental.pallas import tpu as pltpu


def _round_up(x, m):
    return (x + m - 1) // m * m


# ----------------------------------------------------------------------------
# Pallas kernel: fused 2-layer MLP with split-K first matmul.
#   o = relu( sum_c x_c @ w1_c + b1 ) @ w2 + b2
# ----------------------------------------------------------------------------
def _mlp2_kernel(*refs, n_chunks):
    x_refs = refs[:n_chunks]
    w1_refs = refs[n_chunks:2 * n_chunks]
    b1_ref, w2_ref, b2_ref, o_ref = refs[2 * n_chunks:]

    # Split-K layer-1 matmul: one MXU dot per input chunk, f32 accumulation.
    acc = jnp.dot(x_refs[0][...], w1_refs[0][...],
                  preferred_element_type=jnp.float32)
    for c in range(1, n_chunks):
        acc += jnp.dot(x_refs[c][...], w1_refs[c][...],
                       preferred_element_type=jnp.float32)

    # Epilogue (bias + relu) in f32 on the VPU (v5e has no bf16 VPU).
    h = jnp.maximum(acc + b1_ref[...], 0.0)
    o = jnp.dot(h.astype(w2_ref.dtype), w2_ref[...],
                preferred_element_type=jnp.float32)
    # TODO(synk): Dout (=16) << 128 makes this store lane-sparse (vst.msk); a
    # lane-dense repack into a (tile//8, 8*Dout) slab needs an in-kernel
    # sublane->lane relayout and is left out pending measurement.
    o_ref[...] = (o + b2_ref[...]).astype(o_ref.dtype)


def _mlp2(xs, w1s, b1, w2, b2, *, tile_rows=4096, compute_dtype=jnp.bfloat16):
    """Row-tiled fused 2-layer MLP (split-K inputs) via pallas_call."""
    assert len(xs) == len(w1s)
    R = int(xs[0].shape[0])
    ks = tuple(int(x.shape[1]) for x in xs)
    H = int(w1s[0].shape[1])
    Dout = int(w2.shape[1])
    cdt = jnp.dtype(compute_dtype)

    if R == 0:  # degenerate empty graph
        return jnp.zeros((0, Dout), cdt)

    # Row-tile selection: sublane granule 16 for bf16 packing (8 for f32),
    # >= 2 grid steps when possible (v7x megacore), capped at tile_rows.
    granule = 16 if cdt == jnp.dtype(jnp.bfloat16) else 8
    tile_rows = max(granule, _round_up(tile_rows, granule))
    if R <= tile_rows:
        tile = _round_up(pl.cdiv(R, 2), granule)
    else:
        tile = tile_rows
    tile = min(tile, _round_up(R, granule))
    if tile >= R:
        tile = R  # single full block (block dim == array dim is always legal)
    grid = (pl.cdiv(R, tile),)

    xs = [x.astype(cdt) for x in xs]
    w1s = [w.astype(cdt) for w in w1s]
    w2c = w2.astype(cdt)
    b1c = b1.astype(jnp.float32)
    b2c = b2.astype(jnp.float32)

    x_specs = [pl.BlockSpec((tile, k), lambda i: (i, 0)) for k in ks]
    w1_specs = [pl.BlockSpec((k, H), lambda i: (0, 0)) for k in ks]
    tail_specs = [pl.BlockSpec((1, H), lambda i: (0, 0)),      # b1
                  pl.BlockSpec((H, Dout), lambda i: (0, 0)),   # w2
                  pl.BlockSpec((1, Dout), lambda i: (0, 0))]   # b2

    itemsize = cdt.itemsize
    k_total = sum(ks)
    flops = 2 * R * (k_total * H + H * Dout)
    bytes_accessed = (R * (k_total + Dout) * itemsize
                      + (k_total * H + H * Dout) * itemsize
                      + (H + Dout) * 4)

    out = pl.pallas_call(
        functools.partial(_mlp2_kernel, n_chunks=len(xs)),
        out_shape=jax.ShapeDtypeStruct((R, Dout), cdt),
        grid_spec=pltpu.PrefetchScalarGridSpec(
            num_scalar_prefetch=0,
            grid=grid,
            in_specs=x_specs + w1_specs + tail_specs,
            out_specs=pl.BlockSpec((tile, Dout), lambda i: (i, 0)),
        ),
        compiler_params=pltpu.CompilerParams(
            dimension_semantics=("parallel",),          # rows independent
            vmem_limit_bytes=48 * 1024 * 1024,          # v7x-safe (64 MiB phys)
        ),
        cost_estimate=pl.CostEstimate(flops=flops, transcendentals=0,
                                      bytes_accessed=bytes_accessed),
    )(*xs, *w1s, b1c, w2c, b2c)
    return out


# ----------------------------------------------------------------------------
# Full RFMBlock forward
# ----------------------------------------------------------------------------
def rfm_block(edge_feat, node_feat, g_repr, src_idx, dst_idx,
              edge_graph, node_graph, p, *, compute_dtype=jnp.bfloat16,
              tile_rows=4096):
    N = node_feat.shape[0]
    B = g_repr.shape[0]
    De = edge_feat.shape[1]
    Dn = node_feat.shape[1]
    Dout = p["we2"].shape[1]

    # Graph plumbing (DGL apply_edges / update_all / sum_nodes / sum_edges)
    # stays in XLA as real gathers + segment-sums.
    # TODO(synk): fusing the gathers / the edge->node segment-sum into the
    # Pallas kernels (scalar-prefetched indices, in-kernel accumulation) is a
    # further win for very large E; not implemented here.
    src_f = jnp.take(node_feat, src_idx, axis=0)
    dst_f = jnp.take(node_feat, dst_idx, axis=0)
    u_e = jnp.take(g_repr, edge_graph, axis=0)
    u_n = jnp.take(g_repr, node_graph, axis=0)

    mlp = functools.partial(_mlp2, tile_rows=tile_rows,
                            compute_dtype=compute_dtype)

    # edge update: fc_edge2(relu(fc_edge([e, src, dst, u])))  (split-K, no concat)
    we_chunks = jnp.split(p["we"], (De, De + Dn, De + 2 * Dn), axis=0)
    e_new = mlp([edge_feat, src_f, dst_f, u_e], we_chunks,
                p["be"], p["we2"], p["be2"])

    # message passing: h[n] = sum of incoming (new) edge feats
    h = jax.ops.segment_sum(e_new, dst_idx, num_segments=N)

    # node update: fc_node2(relu(fc_node([n, h, u])))
    wn_chunks = jnp.split(p["wn"], (Dn, Dn + Dout), axis=0)
    n_new = mlp([node_feat, h, u_n], wn_chunks, p["bn"], p["wn2"], p["bn2"])

    # global update: fc_u2(relu(fc_u([sum_nodes, sum_edges, u])))
    e_comb = jax.ops.segment_sum(e_new, edge_graph, num_segments=B)
    n_comb = jax.ops.segment_sum(n_new, node_graph, num_segments=B)
    wu_chunks = jnp.split(p["wu"], (Dout, 2 * Dout), axis=0)
    g_new = mlp([n_comb, e_comb, g_repr], wu_chunks, p["bu"], p["wu2"], p["bu2"])

    return e_new, n_new, g_new


# ----------------------------------------------------------------------------
# Parameters & pure-JAX reference
# ----------------------------------------------------------------------------
def init_params(key, De, Dn, Du, H, Dout):
    """PyTorch nn.Linear-style init (uniform +/- 1/sqrt(fan_in)); weights stored
    as (in, out), fused along the concatenated input dimension."""
    dim_in_edge = De + 2 * Dn + Du
    dim_in_node = Dn + Dout + Du
    dim_in_u = 2 * Dout + Du
    keys = jax.random.split(key, 12)

    def lin(kw, kb, fin, fout):
        bound = 1.0 / np.sqrt(fin)
        w = jax.random.uniform(kw, (fin, fout), jnp.float32, -bound, bound)
        b = jax.random.uniform(kb, (1, fout), jnp.float32, -bound, bound)
        return w, b

    we, be = lin(keys[0], keys[1], dim_in_edge, H)
    we2, be2 = lin(keys[2], keys[3], H, Dout)
    wn, bn = lin(keys[4], keys[5], dim_in_node, H)
    wn2, bn2 = lin(keys[6], keys[7], H, Dout)
    wu, bu = lin(keys[8], keys[9], dim_in_u, H)
    wu2, bu2 = lin(keys[10], keys[11], H, Dout)
    return dict(we=we, be=be, we2=we2, be2=be2,
                wn=wn, bn=bn, wn2=wn2, bn2=bn2,
                wu=wu, bu=bu, wu2=wu2, bu2=bu2)


def reference(edge_feat, node_feat, g_repr, src_idx, dst_idx,
              edge_graph, node_graph, p):
    """Pure-JAX (f32) reference of the PyTorch/DGL forward."""
    act = lambda x: jnp.maximum(x, 0.0)

    inp_e = jnp.concatenate(
        [edge_feat, node_feat[src_idx], node_feat[dst_idx], g_repr[edge_graph]], -1)
    e_new = act(inp_e @ p["we"] + p["be"]) @ p["we2"] + p["be2"]

    h = jnp.zeros((node_feat.shape[0], e_new.shape[1])).at[dst_idx].add(e_new)
    inp_n = jnp.concatenate([node_feat, h, g_repr[node_graph]], -1)
    n_new = act(inp_n @ p["wn"] + p["bn"]) @ p["wn2"] + p["bn2"]

    e_comb = jnp.zeros((g_repr.shape[0], e_new.shape[1])).at[edge_graph].add(e_new)
    n_comb = jnp.zeros_like(e_comb).at[node_graph].add(n_new)
    inp_u = jnp.concatenate([n_comb, e_comb, g_repr], -1)
    g_new = act(inp_u @ p["wu"] + p["bu"]) @ p["wu2"] + p["bu2"]
    return e_new, n_new, g_new


# ----------------------------------------------------------------------------
if __name__ == "__main__":
    # batched graph: B=2 graphs, each fully-connected directed with 4 nodes
    B, nodes_per_graph = 2, 4
    src_l, dst_l, eg_l, ng_l = [], [], [], []
    for b in range(B):
        off = b * nodes_per_graph
        for i in range(nodes_per_graph):
            ng_l.append(b)
            for j in range(nodes_per_graph):
                if i != j:
                    src_l.append(off + i)
                    dst_l.append(off + j)
                    eg_l.append(b)
    src_idx = jnp.asarray(src_l, jnp.int32)
    dst_idx = jnp.asarray(dst_l, jnp.int32)
    edge_graph = jnp.asarray(eg_l, jnp.int32)
    node_graph = jnp.asarray(ng_l, jnp.int32)
    E, N = src_idx.shape[0], B * nodes_per_graph       # 24 edges, 8 nodes

    De, Dn, Du, H, Dout = 6, 8, 10, 32, 16

    key = jax.random.PRNGKey(0)
    k_e, k_n, k_g, k_p = jax.random.split(key, 4)
    edge_feat = jax.random.normal(k_e, (E, De), jnp.float32)
    node_feat = jax.random.normal(k_n, (N, Dn), jnp.float32)
    g_repr = jax.random.normal(k_g, (B, Du), jnp.float32)
    params = init_params(k_p, De, Dn, Du, H, Dout)

    e_ref, n_ref, g_ref = reference(edge_feat, node_feat, g_repr,
                                    src_idx, dst_idx, edge_graph, node_graph,
                                    params)

    # --- f32 path: checked tightly against the reference ---
    fwd_f32 = jax.jit(functools.partial(rfm_block, compute_dtype=jnp.float32))
    e_out, n_out, g_out = fwd_f32(edge_feat, node_feat, g_repr,
                                  src_idx, dst_idx, edge_graph, node_graph,
                                  params)
    jax.block_until_ready((e_out, n_out, g_out))
    np.testing.assert_allclose(np.asarray(e_out), np.asarray(e_ref), rtol=1e-4, atol=1e-4)
    np.testing.assert_allclose(np.asarray(n_out), np.asarray(n_ref), rtol=1e-4, atol=1e-4)
    np.testing.assert_allclose(np.asarray(g_out), np.asarray(g_ref), rtol=1e-4, atol=1e-4)

    # --- default bf16 fast path (f32 MXU accumulation / epilogue) ---
    fwd_bf16 = jax.jit(functools.partial(rfm_block))     # compute_dtype=bf16 default
    e_b, n_b, g_b = fwd_bf16(edge_feat, node_feat, g_repr,
                             src_idx, dst_idx, edge_graph, node_graph, params)
    jax.block_until_ready((e_b, n_b, g_b))
    to_f32 = lambda a: np.asarray(a.astype(jnp.float32))
    np.testing.assert_allclose(to_f32(e_b), np.asarray(e_ref), rtol=1e-1, atol=2.5e-1)
    np.testing.assert_allclose(to_f32(n_b), np.asarray(n_ref), rtol=1e-1, atol=2.5e-1)
    np.testing.assert_allclose(to_f32(g_b), np.asarray(g_ref), rtol=1e-1, atol=2.5e-1)

    print("KERNEL_OK")
</pallas_src>

<mosaic_0001>
module attributes {stable_mosaic.version = 11 : i64} {
  func.func @_mlp2_kernel(%arg0: i32, %arg1: memref<16x6xf32, #tpu.memory_space<vmem>>, %arg2: memref<16x8xf32, #tpu.memory_space<vmem>>, %arg3: memref<16x8xf32, #tpu.memory_space<vmem>>, %arg4: memref<16x10xf32, #tpu.memory_space<vmem>>, %arg5: memref<6x32xf32, #tpu.memory_space<vmem>>, %arg6: memref<8x32xf32, #tpu.memory_space<vmem>>, %arg7: memref<8x32xf32, #tpu.memory_space<vmem>>, %arg8: memref<10x32xf32, #tpu.memory_space<vmem>>, %arg9: memref<1x32xf32, #tpu.memory_space<vmem>>, %arg10: memref<32x16xf32, #tpu.memory_space<vmem>>, %arg11: memref<1x16xf32, #tpu.memory_space<vmem>>, %arg12: memref<16x16xf32, #tpu.memory_space<vmem>>) attributes {dimension_semantics = [#tpu.dimension_semantics<parallel>], iteration_bounds = array<i64: 2>, scalar_prefetch = 0 : i64, scratch_operands = 0 : i64, tpu.core_type = #tpu.core_type<tc>, window_params = [{transform_indices = @transform_0, window_bounds = array<i64: 16, 6>}, {transform_indices = @transform_1, window_bounds = array<i64: 16, 8>}, {transform_indices = @transform_2, window_bounds = array<i64: 16, 8>}, {transform_indices = @transform_3, window_bounds = array<i64: 16, 10>}, {pipeline_mode = #tpu.pipeline_mode<synchronous>, transform_indices = @transform_4, window_bounds = array<i64: 6, 32>}, {pipeline_mode = #tpu.pipeline_mode<synchronous>, transform_indices = @transform_5, window_bounds = array<i64: 8, 32>}, {pipeline_mode = #tpu.pipeline_mode<synchronous>, transform_indices = @transform_6, window_bounds = array<i64: 8, 32>}, {pipeline_mode = #tpu.pipeline_mode<synchronous>, transform_indices = @transform_7, window_bounds = array<i64: 10, 32>}, {pipeline_mode = #tpu.pipeline_mode<synchronous>, transform_indices = @transform_8, window_bounds = array<i64: 1, 32>}, {pipeline_mode = #tpu.pipeline_mode<synchronous>, transform_indices = @transform_9, window_bounds = array<i64: 32, 16>}, {pipeline_mode = #tpu.pipeline_mode<synchronous>, transform_indices = @transform_10, window_bounds = array<i64: 1, 16>}, {transform_indices = @transform_11, window_bounds = array<i64: 16, 16>}]} {
    %c0 = arith.constant 0 : index
    %c0_0 = arith.constant 0 : index
    %0 = vector.load %arg1[%c0, %c0_0] : memref<16x6xf32, #tpu.memory_space<vmem>>, vector<16x6xf32>
    %c0_1 = arith.constant 0 : index
    %c0_2 = arith.constant 0 : index
    %1 = vector.load %arg5[%c0_1, %c0_2] : memref<6x32xf32, #tpu.memory_space<vmem>>, vector<6x32xf32>
    %cst = arith.constant dense<0.000000e+00> : vector<16x32xf32>
    %2 = tpu.matmul %0, %1, %cst {dimension_numbers = #tpu.dot_dimension_numbers<[1], [0], [0], [1], [0, 0, 1, 1], [], []>} : vector<16x6xf32>, vector<6x32xf32>, vector<16x32xf32> -> vector<16x32xf32>
    %c0_3 = arith.constant 0 : index
    %c0_4 = arith.constant 0 : index
    %3 = vector.load %arg2[%c0_3, %c0_4] : memref<16x8xf32, #tpu.memory_space<vmem>>, vector<16x8xf32>
    %c0_5 = arith.constant 0 : index
    %c0_6 = arith.constant 0 : index
    %4 = vector.load %arg6[%c0_5, %c0_6] : memref<8x32xf32, #tpu.memory_space<vmem>>, vector<8x32xf32>
    %cst_7 = arith.constant dense<0.000000e+00> : vector<16x32xf32>
    %5 = tpu.matmul %3, %4, %cst_7 {dimension_numbers = #tpu.dot_dimension_numbers<[1], [0], [0], [1], [0, 0, 1, 1], [], []>} : vector<16x8xf32>, vector<8x32xf32>, vector<16x32xf32> -> vector<16x32xf32>
    %6 = arith.addf %2, %5 : vector<16x32xf32>
    %c0_8 = arith.constant 0 : index
    %c0_9 = arith.constant 0 : index
    %7 = vector.load %arg3[%c0_8, %c0_9] : memref<16x8xf32, #tpu.memory_space<vmem>>, vector<16x8xf32>
    %c0_10 = arith.constant 0 : index
    %c0_11 = arith.constant 0 : index
    %8 = vector.load %arg7[%c0_10, %c0_11] : memref<8x32xf32, #tpu.memory_space<vmem>>, vector<8x32xf32>
    %cst_12 = arith.constant dense<0.000000e+00> : vector<16x32xf32>
    %9 = tpu.matmul %7, %8, %cst_12 {dimension_numbers = #tpu.dot_dimension_numbers<[1], [0], [0], [1], [0, 0, 1, 1], [], []>} : vector<16x8xf32>, vector<8x32xf32>, vector<16x32xf32> -> vector<16x32xf32>
    %10 = arith.addf %6, %9 : vector<16x32xf32>
    %c0_13 = arith.constant 0 : index
    %c0_14 = arith.constant 0 : index
    %11 = vector.load %arg4[%c0_13, %c0_14] : memref<16x10xf32, #tpu.memory_space<vmem>>, vector<16x10xf32>
    %c0_15 = arith.constant 0 : index
    %c0_16 = arith.constant 0 : index
    %12 = vector.load %arg8[%c0_15, %c0_16] : memref<10x32xf32, #tpu.memory_space<vmem>>, vector<10x32xf32>
    %cst_17 = arith.constant dense<0.000000e+00> : vector<16x32xf32>
    %13 = tpu.matmul %11, %12, %cst_17 {dimension_numbers = #tpu.dot_dimension_numbers<[1], [0], [0], [1], [0, 0, 1, 1], [], []>} : vector<16x10xf32>, vector<10x32xf32>, vector<16x32xf32> -> vector<16x32xf32>
    %14 = arith.addf %10, %13 : vector<16x32xf32>
    %c0_18 = arith.constant 0 : index
    %c0_19 = arith.constant 0 : index
    %15 = vector.load %arg9[%c0_18, %c0_19] : memref<1x32xf32, #tpu.memory_space<vmem>>, vector<1x32xf32>
    %16 = vector.broadcast %15 : vector<1x32xf32> to vector<16x32xf32>
    %17 = arith.addf %14, %16 : vector<16x32xf32>
    %cst_20 = arith.constant 0.000000e+00 : f32
    %18 = vector.broadcast %cst_20 : f32 to vector<16x32xf32>
    %19 = arith.maximumf %17, %18 : vector<16x32xf32>
    %c0_21 = arith.constant 0 : index
    %c0_22 = arith.constant 0 : index
    %20 = vector.load %arg10[%c0_21, %c0_22] : memref<32x16xf32, #tpu.memory_space<vmem>>, vector<32x16xf32>
    %cst_23 = arith.constant dense<0.000000e+00> : vector<16x16xf32>
    %21 = tpu.matmul %19, %20, %cst_23 {dimension_numbers = #tpu.dot_dimension_numbers<[1], [0], [0], [1], [0, 0, 1, 1], [], []>} : vector<16x32xf32>, vector<32x16xf32>, vector<16x16xf32> -> vector<16x16xf32>
    %c0_24 = arith.constant 0 : index
    %c0_25 = arith.constant 0 : index
    %22 = vector.load %arg11[%c0_24, %c0_25] : memref<1x16xf32, #tpu.memory_space<vmem>>, vector<1x16xf32>
    %23 = vector.broadcast %22 : vector<1x16xf32> to vector<16x16xf32>
    %24 = arith.addf %21, %23 : vector<16x16xf32>
    %c0_26 = arith.constant 0 : index
    %c0_27 = arith.constant 0 : index
    %25 = vector.load %arg12[%c0_26, %c0_27] : memref<16x16xf32, #tpu.memory_space<vmem>>, vector<16x16xf32>
    tpu.vector_store %arg12[%c0_26, %c0_27], %24 {strides = array<i32>} : memref<16x16xf32, #tpu.memory_space<vmem>>, vector<16x16xf32>,
    return
  }
  func.func @transform_0(%arg0: i32) -> (i32, i32) {
    %c0_i32 = arith.constant 0 : i32
    %c0_i32_0 = arith.constant 0 : i32
    return %arg0, %c0_i32 : i32, i32
  }
  func.func @transform_1(%arg0: i32) -> (i32, i32) {
    %c0_i32 = arith.constant 0 : i32
    %c0_i32_0 = arith.constant 0 : i32
    return %arg0, %c0_i32 : i32, i32
  }
  func.func @transform_2(%arg0: i32) -> (i32, i32) {
    %c0_i32 = arith.constant 0 : i32
    %c0_i32_0 = arith.constant 0 : i32
    return %arg0, %c0_i32 : i32, i32
  }
  func.func @transform_3(%arg0: i32) -> (i32, i32) {
    %c0_i32 = arith.constant 0 : i32
    %c0_i32_0 = arith.constant 0 : i32
    return %arg0, %c0_i32 : i32, i32
  }
  func.func @transform_4(%arg0: i32) -> (i32, i32) {
    %c0_i32 = arith.constant 0 : i32
    %c0_i32_0 = arith.constant 0 : i32
    %c0_i32_1 = arith.constant 0 : i32
    return %c0_i32, %c0_i32_0 : i32, i32
  }
  func.func @transform_5(%arg0: i32) -> (i32, i32) {
    %c0_i32 = arith.constant 0 : i32
    %c0_i32_0 = arith.constant 0 : i32
    %c0_i32_1 = arith.constant 0 : i32
    return %c0_i32, %c0_i32_0 : i32, i32
  }
  func.func @transform_6(%arg0: i32) -> (i32, i32) {
    %c0_i32 = arith.constant 0 : i32
    %c0_i32_0 = arith.constant 0 : i32
    %c0_i32_1 = arith.constant 0 : i32
    return %c0_i32, %c0_i32_0 : i32, i32
  }
  func.func @transform_7(%arg0: i32) -> (i32, i32) {
    %c0_i32 = arith.constant 0 : i32
    %c0_i32_0 = arith.constant 0 : i32
    %c0_i32_1 = arith.constant 0 : i32
    return %c0_i32, %c0_i32_0 : i32, i32
  }
  func.func @transform_8(%arg0: i32) -> (i32, i32) {
    %c0_i32 = arith.constant 0 : i32
    %c0_i32_0 = arith.constant 0 : i32
    %c0_i32_1 = arith.constant 0 : i32
    return %c0_i32, %c0_i32_0 : i32, i32
  }
  func.func @transform_9(%arg0: i32) -> (i32, i32) {
    %c0_i32 = arith.constant 0 : i32
    %c0_i32_0 = arith.constant 0 : i32
    %c0_i32_1 = arith.constant 0 : i32
    return %c0_i32, %c0_i32_0 : i32, i32
  }
  func.func @transform_10(%arg0: i32) -> (i32, i32) {
    %c0_i32 = arith.constant 0 : i32
    %c0_i32_0 = arith.constant 0 : i32
    %c0_i32_1 = arith.constant 0 : i32
    return %c0_i32, %c0_i32_0 : i32, i32
  }
  func.func @transform_11(%arg0: i32) -> (i32, i32) {
    %c0_i32 = arith.constant 0 : i32
    %c0_i32_0 = arith.constant 0 : i32
    return %arg0, %c0_i32 : i32, i32
  }
}

module attributes {stable_mosaic.version = 11 : i64} {
  func.func @_mlp2_kernel(%arg0: i32, %arg1: memref<8x8xf32, #tpu.memory_space<vmem>>, %arg2: memref<8x16xf32, #tpu.memory_space<vmem>>, %arg3: memref<8x10xf32, #tpu.memory_space<vmem>>, %arg4: memref<8x32xf32, #tpu.memory_space<vmem>>, %arg5: memref<16x32xf32, #tpu.memory_space<vmem>>, %arg6: memref<10x32xf32, #tpu.memory_space<vmem>>, %arg7: memref<1x32xf32, #tpu.memory_space<vmem>>, %arg8: memref<32x16xf32, #tpu.memory_space<vmem>>, %arg9: memref<1x16xf32, #tpu.memory_space<vmem>>, %arg10: memref<8x16xf32, #tpu.memory_space<vmem>>) attributes {dimension_semantics = [#tpu.dimension_semantics<parallel>], iteration_bounds = array<i64: 1>, scalar_prefetch = 0 : i64, scratch_operands = 0 : i64, tpu.core_type = #tpu.core_type<tc>, window_params = [{transform_indices = @transform_0, window_bounds = array<i64: 8, 8>}, {transform_indices = @transform_1, window_bounds = array<i64: 8, 16>}, {transform_indices = @transform_2, window_bounds = array<i64: 8, 10>}, {pipeline_mode = #tpu.pipeline_mode<synchronous>, transform_indices = @transform_3, window_bounds = array<i64: 8, 32>}, {pipeline_mode = #tpu.pipeline_mode<synchronous>, transform_indices = @transform_4, window_bounds = array<i64: 16, 32>}, {pipeline_mode = #tpu.pipeline_mode<synchronous>, transform_indices = @transform_5, window_bounds = array<i64: 10, 32>}, {pipeline_mode = #tpu.pipeline_mode<synchronous>, transform_indices = @transform_6, window_bounds = array<i64: 1, 32>}, {pipeline_mode = #tpu.pipeline_mode<synchronous>, transform_indices = @transform_7, window_bounds = array<i64: 32, 16>}, {pipeline_mode = #tpu.pipeline_mode<synchronous>, transform_indices = @transform_8, window_bounds = array<i64: 1, 16>}, {transform_indices = @transform_9, window_bounds = array<i64: 8, 16>}]} {
    %c0 = arith.constant 0 : index
    %c0_0 = arith.constant 0 : index
    %0 = vector.load %arg1[%c0, %c0_0] : memref<8x8xf32, #tpu.memory_space<vmem>>, vector<8x8xf32>
    %c0_1 = arith.constant 0 : index
    %c0_2 = arith.constant 0 : index
    %1 = vector.load %arg4[%c0_1, %c0_2] : memref<8x32xf32, #tpu.memory_space<vmem>>, vector<8x32xf32>
    %cst = arith.constant dense<0.000000e+00> : vector<8x32xf32>
    %2 = tpu.matmul %0, %1, %cst {dimension_numbers = #tpu.dot_dimension_numbers<[1], [0], [0], [1], [0, 0, 1, 1], [], []>} : vector<8x8xf32>, vector<8x32xf32>, vector<8x32xf32> -> vector<8x32xf32>
    %c0_3 = arith.constant 0 : index
    %c0_4 = arith.constant 0 : index
    %3 = vector.load %arg2[%c0_3, %c0_4] : memref<8x16xf32, #tpu.memory_space<vmem>>, vector<8x16xf32>
    %c0_5 = arith.constant 0 : index
    %c0_6 = arith.constant 0 : index
    %4 = vector.load %arg5[%c0_5, %c0_6] : memref<16x32xf32, #tpu.memory_space<vmem>>, vector<16x32xf32>
    %cst_7 = arith.constant dense<0.000000e+00> : vector<8x32xf32>
    %5 = tpu.matmul %3, %4, %cst_7 {dimension_numbers = #tpu.dot_dimension_numbers<[1], [0], [0], [1], [0, 0, 1, 1], [], []>} : vector<8x16xf32>, vector<16x32xf32>, vector<8x32xf32> -> vector<8x32xf32>
    %6 = arith.addf %2, %5 : vector<8x32xf32>
    %c0_8 = arith.constant 0 : index
    %c0_9 = arith.constant 0 : index
    %7 = vector.load %arg3[%c0_8, %c0_9] : memref<8x10xf32, #tpu.memory_space<vmem>>, vector<8x10xf32>
    %c0_10 = arith.constant 0 : index
    %c0_11 = arith.constant 0 : index
    %8 = vector.load %arg6[%c0_10, %c0_11] : memref<10x32xf32, #tpu.memory_space<vmem>>, vector<10x32xf32>
    %cst_12 = arith.constant dense<0.000000e+00> : vector<8x32xf32>
    %9 = tpu.matmul %7, %8, %cst_12 {dimension_numbers = #tpu.dot_dimension_numbers<[1], [0], [0], [1], [0, 0, 1, 1], [], []>} : vector<8x10xf32>, vector<10x32xf32>, vector<8x32xf32> -> vector<8x32xf32>
    %10 = arith.addf %6, %9 : vector<8x32xf32>
    %c0_13 = arith.constant 0 : index
    %c0_14 = arith.constant 0 : index
    %11 = vector.load %arg7[%c0_13, %c0_14] : memref<1x32xf32, #tpu.memory_space<vmem>>, vector<1x32xf32>
    %12 = vector.broadcast %11 : vector<1x32xf32> to vector<8x32xf32>
    %13 = arith.addf %10, %12 : vector<8x32xf32>
    %cst_15 = arith.constant 0.000000e+00 : f32
    %14 = vector.broadcast %cst_15 : f32 to vector<8x32xf32>
    %15 = arith.maximumf %13, %14 : vector<8x32xf32>
    %c0_16 = arith.constant 0 : index
    %c0_17 = arith.constant 0 : index
    %16 = vector.load %arg8[%c0_16, %c0_17] : memref<32x16xf32, #tpu.memory_space<vmem>>, vector<32x16xf32>
    %cst_18 = arith.constant dense<0.000000e+00> : vector<8x16xf32>
    %17 = tpu.matmul %15, %16, %cst_18 {dimension_numbers = #tpu.dot_dimension_numbers<[1], [0], [0], [1], [0, 0, 1, 1], [], []>} : vector<8x32xf32>, vector<32x16xf32>, vector<8x16xf32> -> vector<8x16xf32>
    %c0_19 = arith.constant 0 : index
    %c0_20 = arith.constant 0 : index
    %18 = vector.load %arg9[%c0_19, %c0_20] : memref<1x16xf32, #tpu.memory_space<vmem>>, vector<1x16xf32>
    %19 = vector.broadcast %18 : vector<1x16xf32> to vector<8x16xf32>
    %20 = arith.addf %17, %19 : vector<8x16xf32>
    %c0_21 = arith.constant 0 : index
    %c0_22 = arith.constant 0 : index
    %21 = vector.load %arg10[%c0_21, %c0_22] : memref<8x16xf32, #tpu.memory_space<vmem>>, vector<8x16xf32>
    tpu.vector_store %arg10[%c0_21, %c0_22], %20 {strides = array<i32>} : memref<8x16xf32, #tpu.memory_space<vmem>>, vector<8x16xf32>,
    return
  }
  func.func @transform_0(%arg0: i32) -> (i32, i32) {
    %c0_i32 = arith.constant 0 : i32
    %c0_i32_0 = arith.constant 0 : i32
    return %arg0, %c0_i32 : i32, i32
  }
  func.func @transform_1(%arg0: i32) -> (i32, i32) {
    %c0_i32 = arith.constant 0 : i32
    %c0_i32_0 = arith.constant 0 : i32
    return %arg0, %c0_i32 : i32, i32
  }
  func.func @transform_2(%arg0: i32) -> (i32, i32) {
    %c0_i32 = arith.constant 0 : i32
    %c0_i32_0 = arith.constant 0 : i32
    return %arg0, %c0_i32 : i32, i32
  }
  func.func @transform_3(%arg0: i32) -> (i32, i32) {
    %c0_i32 = arith.constant 0 : i32
    %c0_i32_0 = arith.constant 0 : i32
    %c0_i32_1 = arith.constant 0 : i32
    return %c0_i32, %c0_i32_0 : i32, i32
  }
  func.func @transform_4(%arg0: i32) -> (i32, i32) {
    %c0_i32 = arith.constant 0 : i32
    %c0_i32_0 = arith.constant 0 : i32
    %c0_i32_1 = arith.constant 0 : i32
    return %c0_i32, %c0_i32_0 : i32, i32
  }
  func.func @transform_5(%arg0: i32) -> (i32, i32) {
    %c0_i32 = arith.constant 0 : i32
    %c0_i32_0 = arith.constant 0 : i32
    %c0_i32_1 = arith.constant 0 : i32
    return %c0_i32, %c0_i32_0 : i32, i32
  }
  func.func @transform_6(%arg0: i32) -> (i32, i32) {
    %c0_i32 = arith.constant 0 : i32
    %c0_i32_0 = arith.constant 0 : i32
    %c0_i32_1 = arith.constant 0 : i32
    return %c0_i32, %c0_i32_0 : i32, i32
  }
  func.func @transform_7(%arg0: i32) -> (i32, i32) {
    %c0_i32 = arith.constant 0 : i32
    %c0_i32_0 = arith.constant 0 : i32
    %c0_i32_1 = arith.constant 0 : i32
    return %c0_i32, %c0_i32_0 : i32, i32
  }
  func.func @transform_8(%arg0: i32) -> (i32, i32) {
    %c0_i32 = arith.constant 0 : i32
    %c0_i32_0 = arith.constant 0 : i32
    %c0_i32_1 = arith.constant 0 : i32
    return %c0_i32, %c0_i32_0 : i32, i32
  }
  func.func @transform_9(%arg0: i32) -> (i32, i32) {
    %c0_i32 = arith.constant 0 : i32
    %c0_i32_0 = arith.constant 0 : i32
    return %arg0, %c0_i32 : i32, i32
  }
}

module attributes {stable_mosaic.version = 11 : i64} {
  func.func @_mlp2_kernel(%arg0: i32, %arg1: memref<2x16xf32, #tpu.memory_space<vmem>>, %arg2: memref<2x16xf32, #tpu.memory_space<vmem>>, %arg3: memref<2x10xf32, #tpu.memory_space<vmem>>, %arg4: memref<16x32xf32, #tpu.memory_space<vmem>>, %arg5: memref<16x32xf32, #tpu.memory_space<vmem>>, %arg6: memref<10x32xf32, #tpu.memory_space<vmem>>, %arg7: memref<1x32xf32, #tpu.memory_space<vmem>>, %arg8: memref<32x16xf32, #tpu.memory_space<vmem>>, %arg9: memref<1x16xf32, #tpu.memory_space<vmem>>, %arg10: memref<2x16xf32, #tpu.memory_space<vmem>>) attributes {dimension_semantics = [#tpu.dimension_semantics<parallel>], iteration_bounds = array<i64: 1>, scalar_prefetch = 0 : i64, scratch_operands = 0 : i64, tpu.core_type = #tpu.core_type<tc>, window_params = [{transform_indices = @transform_0, window_bounds = array<i64: 2, 16>}, {transform_indices = @transform_1, window_bounds = array<i64: 2, 16>}, {transform_indices = @transform_2, window_bounds = array<i64: 2, 10>}, {pipeline_mode = #tpu.pipeline_mode<synchronous>, transform_indices = @transform_3, window_bounds = array<i64: 16, 32>}, {pipeline_mode = #tpu.pipeline_mode<synchronous>, transform_indices = @transform_4, window_bounds = array<i64: 16, 32>}, {pipeline_mode = #tpu.pipeline_mode<synchronous>, transform_indices = @transform_5, window_bounds = array<i64: 10, 32>}, {pipeline_mode = #tpu.pipeline_mode<synchronous>, transform_indices = @transform_6, window_bounds = array<i64: 1, 32>}, {pipeline_mode = #tpu.pipeline_mode<synchronous>, transform_indices = @transform_7, window_bounds = array<i64: 32, 16>}, {pipeline_mode = #tpu.pipeline_mode<synchronous>, transform_indices = @transform_8, window_bounds = array<i64: 1, 16>}, {transform_indices = @transform_9, window_bounds = array<i64: 2, 16>}]} {
    %c0 = arith.constant 0 : index
    %c0_0 = arith.constant 0 : index
    %0 = vector.load %arg1[%c0, %c0_0] : memref<2x16xf32, #tpu.memory_space<vmem>>, vector<2x16xf32>
    %c0_1 = arith.constant 0 : index
    %c0_2 = arith.constant 0 : index
    %1 = vector.load %arg4[%c0_1, %c0_2] : memref<16x32xf32, #tpu.memory_space<vmem>>, vector<16x32xf32>
    %cst = arith.constant dense<0.000000e+00> : vector<2x32xf32>
    %2 = tpu.matmul %0, %1, %cst {dimension_numbers = #tpu.dot_dimension_numbers<[1], [0], [0], [1], [0, 0, 1, 1], [], []>} : vector<2x16xf32>, vector<16x32xf32>, vector<2x32xf32> -> vector<2x32xf32>
    %c0_3 = arith.constant 0 : index
    %c0_4 = arith.constant 0 : index
    %3 = vector.load %arg2[%c0_3, %c0_4] : memref<2x16xf32, #tpu.memory_space<vmem>>, vector<2x16xf32>
    %c0_5 = arith.constant 0 : index
    %c0_6 = arith.constant 0 : index
    %4 = vector.load %arg5[%c0_5, %c0_6] : memref<16x32xf32, #tpu.memory_space<vmem>>, vector<16x32xf32>
    %cst_7 = arith.constant dense<0.000000e+00> : vector<2x32xf32>
    %5 = tpu.matmul %3, %4, %cst_7 {dimension_numbers = #tpu.dot_dimension_numbers<[1], [0], [0], [1], [0, 0, 1, 1], [], []>} : vector<2x16xf32>, vector<16x32xf32>, vector<2x32xf32> -> vector<2x32xf32>
    %6 = arith.addf %2, %5 : vector<2x32xf32>
    %c0_8 = arith.constant 0 : index
    %c0_9 = arith.constant 0 : index
    %7 = vector.load %arg3[%c0_8, %c0_9] : memref<2x10xf32, #tpu.memory_space<vmem>>, vector<2x10xf32>
    %c0_10 = arith.constant 0 : index
    %c0_11 = arith.constant 0 : index
    %8 = vector.load %arg6[%c0_10, %c0_11] : memref<10x32xf32, #tpu.memory_space<vmem>>, vector<10x32xf32>
    %cst_12 = arith.constant dense<0.000000e+00> : vector<2x32xf32>
    %9 = tpu.matmul %7, %8, %cst_12 {dimension_numbers = #tpu.dot_dimension_numbers<[1], [0], [0], [1], [0, 0, 1, 1], [], []>} : vector<2x10xf32>, vector<10x32xf32>, vector<2x32xf32> -> vector<2x32xf32>
    %10 = arith.addf %6, %9 : vector<2x32xf32>
    %c0_13 = arith.constant 0 : index
    %c0_14 = arith.constant 0 : index
    %11 = vector.load %arg7[%c0_13, %c0_14] : memref<1x32xf32, #tpu.memory_space<vmem>>, vector<1x32xf32>
    %12 = vector.broadcast %11 : vector<1x32xf32> to vector<2x32xf32>
    %13 = arith.addf %10, %12 : vector<2x32xf32>
    %cst_15 = arith.constant 0.000000e+00 : f32
    %14 = vector.broadcast %cst_15 : f32 to vector<2x32xf32>
    %15 = arith.maximumf %13, %14 : vector<2x32xf32>
    %c0_16 = arith.constant 0 : index
    %c0_17 = arith.constant 0 : index
    %16 = vector.load %arg8[%c0_16, %c0_17] : memref<32x16xf32, #tpu.memory_space<vmem>>, vector<32x16xf32>
    %cst_18 = arith.constant dense<0.000000e+00> : vector<2x16xf32>
    %17 = tpu.matmul %15, %16, %cst_18 {dimension_numbers = #tpu.dot_dimension_numbers<[1], [0], [0], [1], [0, 0, 1, 1], [], []>} : vector<2x32xf32>, vector<32x16xf32>, vector<2x16xf32> -> vector<2x16xf32>
    %c0_19 = arith.constant 0 : index
    %c0_20 = arith.constant 0 : index
    %18 = vector.load %arg9[%c0_19, %c0_20] : memref<1x16xf32, #tpu.memory_space<vmem>>, vector<1x16xf32>
    %19 = vector.broadcast %18 : vector<1x16xf32> to vector<2x16xf32>
    %20 = arith.addf %17, %19 : vector<2x16xf32>
    %c0_21 = arith.constant 0 : index
    %c0_22 = arith.constant 0 : index
    %21 = vector.load %arg10[%c0_21, %c0_22] : memref<2x16xf32, #tpu.memory_space<vmem>>, vector<2x16xf32>
    tpu.vector_store %arg10[%c0_21, %c0_22], %20 {strides = array<i32>} : memref<2x16xf32, #tpu.memory_space<vmem>>, vector<2x16xf32>,
    return
  }
  func.func @transform_0(%arg0: i32) -> (i32, i32) {
    %c0_i32 = arith.constant 0 : i32
    %c0_i32_0 = arith.constant 0 : i32
    return %arg0, %c0_i32 : i32, i32
  }
  func.func @transform_1(%arg0: i32) -> (i32, i32) {
    %c0_i32 = arith.constant 0 : i32
    %c0_i32_0 = arith.constant 0 : i32
    return %arg0, %c0_i32 : i32, i32
  }
  func.func @transform_2(%arg0: i32) -> (i32, i32) {
    %c0_i32 = arith.constant 0 : i32
    %c0_i32_0 = arith.constant 0 : i32
    return %arg0, %c0_i32 : i32, i32
  }
  func.func @transform_3(%arg0: i32) -> (i32, i32) {
    %c0_i32 = arith.constant 0 : i32
    %c0_i32_0 = arith.constant 0 : i32
    %c0_i32_1 = arith.constant 0 : i32
    return %c0_i32, %c0_i32_0 : i32, i32
  }
  func.func @transform_4(%arg0: i32) -> (i32, i32) {
    %c0_i32 = arith.constant 0 : i32
    %c0_i32_0 = arith.constant 0 : i32
    %c0_i32_1 = arith.constant 0 : i32
    return %c0_i32, %c0_i32_0 : i32, i32
  }
  func.func @transform_5(%arg0: i32) -> (i32, i32) {
    %c0_i32 = arith.constant 0 : i32
    %c0_i32_0 = arith.constant 0 : i32
    %c0_i32_1 = arith.constant 0 : i32
    return %c0_i32, %c0_i32_0 : i32, i32
  }
  func.func @transform_6(%arg0: i32) -> (i32, i32) {
    %c0_i32 = arith.constant 0 : i32
    %c0_i32_0 = arith.constant 0 : i32
    %c0_i32_1 = arith.constant 0 : i32
    return %c0_i32, %c0_i32_0 : i32, i32
  }
  func.func @transform_7(%arg0: i32) -> (i32, i32) {
    %c0_i32 = arith.constant 0 : i32
    %c0_i32_0 = arith.constant 0 : i32
    %c0_i32_1 = arith.constant 0 : i32
    return %c0_i32, %c0_i32_0 : i32, i32
  }
  func.func @transform_8(%arg0: i32) -> (i32, i32) {
    %c0_i32 = arith.constant 0 : i32
    %c0_i32_0 = arith.constant 0 : i32
    %c0_i32_1 = arith.constant 0 : i32
    return %c0_i32, %c0_i32_0 : i32, i32
  }
  func.func @transform_9(%arg0: i32) -> (i32, i32) {
    %c0_i32 = arith.constant 0 : i32
    %c0_i32_0 = arith.constant 0 : i32
    return %arg0, %c0_i32 : i32, i32
  }
}

</mosaic_0001>

<bundles_post_ra>
// kernel: split.13
= control target key start
LH: loop header
LB: loop body
LE: loop exit
PB: predicated region body
PF: predicated region fallthrough
CT: control target
= control target key end

     0   :  { %vm8_vm0 = vcmask 1045504   ;;  %s43_s0 = inlined_call_operand.vmem [shape: f32[32,32], index: 0, kind: input, shape index: {}]   ;;  %s44_s1 = inlined_call_operand.vmem [shape: f32[10,32], index: 1, kind: output, shape index: {}]  }
   0x1   :  { %v18_v0 = vld [vmem:[%s43_s0 + $0x10] sm:$0xff]  ;;  %v19_v1 = vld [vmem:[%s43_s0 + $0x18] sm:$0xff] }
   0x2   :  { %v9_v2 = vsel %vm8_vm0, %v19_v1, %v18_v0  ;;  %v13_v3 = vsel %vm8_vm0, 0, %v19_v1 }
   0x3   :  { %v10_v4 = vrot.slane %v9_v2, 6  ;;  %v14_v5 = vrot.slane %v13_v3, 6 }
   0x5   :  { %11 = vst [vmem:[%s44_s1] sm:$0xff] %v10_v4  ;;  %20 = vst [vmem:[%s44_s1 + $0x8] sm:$0xff] %v14_v5 }

// kernel: split.15
= control target key start
LH: loop header
LB: loop body
LE: loop exit
PB: predicated region body
PF: predicated region fallthrough
CT: control target
= control target key end

     0   :  { %v3_v0 = vlaneseq  ;;  %s82_s0 = inlined_call_operand.vmem [shape: f32[34,32], index: 0, kind: input, shape index: {}]   ;;  %s83_s1 = inlined_call_operand.vmem [shape: f32[16,32], index: 1, kind: output, shape index: {}]  }
   0x1   :  { %v42_v2 = vld [vmem:[%s82_s0 + $0x10] sm:$0xff]  ;;  %v2_v3 = vld [vmem:[%s82_s0] sm:$0xff]  ;;  %v44_v4 = vld [vmem:[%s82_s0 + $0x18] sm:$0xff] }
   0x2   :  { %v4_v1 = vand.u32 127, %v3_v0  ;;  %v40_v5 = vld [vmem:[%s82_s0 + $0x8] sm:$0xff]  ;;  %s47_s0 = smov 120  }
   0x4   :  { %vm5_vm0 = vcmp.lt.s32.totalorder %v4_v1, 8 }
   0x5   :  { %v25_v6 = vsel %vm5_vm0, 0, %v42_v2  ;;  %v6_v7 = vsel %vm5_vm0, 0, %v2_v3  ;;  %v35_v8 = vsel %vm5_vm0, 0, %v44_v4  ;;  %v15_v9 = vsel %vm5_vm0, 0, %v40_v5 }
   0x6   :  { %26 = vrot.lane.b32.xlu1 %v25_v6, %s47_s0  ;;  %7 = vrot.lane.b32.xlu0 %v6_v7, %s47_s0 }
   0xa   :  { %36 = vrot.lane.b32.xlu1 %v35_v8, %s47_s0  ;;  %16 = vrot.lane.b32.xlu0 %v15_v9, %s47_s0 }
  0x78   :  { %v27_v10 = vpop.permute.xlu1 %26  ;;  %v8_v11 = vpop.permute.xlu0 %7 }
  0x79   :  { %43 = vst [vmem:[%s83_s1 + $0x10] sm:$0xff] %v27_v10  ;;  %9 = vst [vmem:[%s83_s1] sm:$0xff] %v8_v11 }
  0x7c   :  { %v37_v12 = vpop.permute.xlu1 %36  ;;  %v17_v13 = vpop.permute.xlu0 %16 }
  0x7d   :  { %45 = vst [vmem:[%s83_s1 + $0x18] sm:$0xff] %v37_v12  ;;  %41 = vst [vmem:[%s83_s1 + $0x8] sm:$0xff] %v17_v13 }

// kernel: split.16
= control target key start
LH: loop header
LB: loop body
LE: loop exit
PB: predicated region body
PF: predicated region fallthrough
CT: control target
= control target key end

     0   :  { %v3_v0 = vlaneseq  ;;  %s82_s0 = inlined_call_operand.vmem [shape: f32[34,32], index: 0, kind: input, shape index: {}]   ;;  %s83_s1 = inlined_call_operand.vmem [shape: f32[10,32], index: 1, kind: output, shape index: {}]  }
   0x1   :  { %v42_v2 = vld [vmem:[%s82_s0 + $0x10] sm:$0xff]  ;;  %v2_v3 = vld [vmem:[%s82_s0] sm:$0xff]  ;;  %v44_v4 = vld [vmem:[%s82_s0 + $0x18] sm:$0xff] }
   0x2   :  { %v4_v1 = vand.u32 127, %v3_v0  ;;  %v40_v5 = vld [vmem:[%s82_s0 + $0x8] sm:$0xff]  ;;  %s47_s0 = smov 104  }
   0x4   :  { %vm5_vm0 = vcmp.lt.s32.totalorder %v4_v1, 24 }
   0x5   :  { %v25_v6 = vsel %vm5_vm0, 0, %v42_v2  ;;  %v6_v7 = vsel %vm5_vm0, 0, %v2_v3  ;;  %v35_v8 = vsel %vm5_vm0, 0, %v44_v4  ;;  %v15_v9 = vsel %vm5_vm0, 0, %v40_v5 }
   0x6   :  { %26 = vrot.lane.b32.xlu1 %v25_v6, %s47_s0  ;;  %7 = vrot.lane.b32.xlu0 %v6_v7, %s47_s0 }
   0xa   :  { %36 = vrot.lane.b32.xlu1 %v35_v8, %s47_s0  ;;  %16 = vrot.lane.b32.xlu0 %v15_v9, %s47_s0 }
  0x78   :  { %v27_v10 = vpop.permute.xlu1 %26  ;;  %v8_v11 = vpop.permute.xlu0 %7 }
  0x79   :  { %43 = vst [vmem:[%s83_s1 + $0x10] sm:$0xff] %v27_v10  ;;  %9 = vst [vmem:[%s83_s1] sm:$0xff] %v8_v11 }
  0x7c   :  { %v37_v12 = vpop.permute.xlu1 %36  ;;  %v17_v13 = vpop.permute.xlu0 %16 }
  0x7d   :  { %45 = vst [vmem:[%s83_s1 + $0x18] sm:$0xff] %v37_v12  ;;  %41 = vst [vmem:[%s83_s1 + $0x8] sm:$0xff] %v17_v13 }

// kernel: split.19
= control target key start
LH: loop header
LB: loop body
LE: loop exit
PB: predicated region body
PF: predicated region fallthrough
CT: control target
= control target key end

     0   :  { %v3_v0 = vlaneseq  ;;  %s82_s0 = inlined_call_operand.vmem [shape: f32[42,32], index: 0, kind: input, shape index: {}]   ;;  %s83_s1 = inlined_call_operand.vmem [shape: f32[10,32], index: 1, kind: output, shape index: {}]  }
   0x1   :  { %v42_v2 = vld [vmem:[%s82_s0 + $0x10] sm:$0xff]  ;;  %v2_v3 = vld [vmem:[%s82_s0] sm:$0xff]  ;;  %v44_v4 = vld [vmem:[%s82_s0 + $0x18] sm:$0xff] }
   0x2   :  { %v4_v1 = vand.u32 127, %v3_v0  ;;  %v40_v5 = vld [vmem:[%s82_s0 + $0x8] sm:$0xff]  ;;  %s47_s0 = smov 96  }
   0x4   :  { %vm5_vm0 = vcmp.lt.s32.totalorder %v4_v1, 32 }
   0x5   :  { %v25_v6 = vsel %vm5_vm0, 0, %v42_v2  ;;  %v6_v7 = vsel %vm5_vm0, 0, %v2_v3  ;;  %v35_v8 = vsel %vm5_vm0, 0, %v44_v4  ;;  %v15_v9 = vsel %vm5_vm0, 0, %v40_v5 }
   0x6   :  { %26 = vrot.lane.b32.xlu1 %v25_v6, %s47_s0  ;;  %7 = vrot.lane.b32.xlu0 %v6_v7, %s47_s0 }
   0xa   :  { %36 = vrot.lane.b32.xlu1 %v35_v8, %s47_s0  ;;  %16 = vrot.lane.b32.xlu0 %v15_v9, %s47_s0 }
  0x78   :  { %v27_v10 = vpop.permute.xlu1 %26  ;;  %v8_v11 = vpop.permute.xlu0 %7 }
  0x79   :  { %43 = vst [vmem:[%s83_s1 + $0x10] sm:$0xff] %v27_v10  ;;  %9 = vst [vmem:[%s83_s1] sm:$0xff] %v8_v11 }
  0x7c   :  { %v37_v12 = vpop.permute.xlu1 %36  ;;  %v17_v13 = vpop.permute.xlu0 %16 }
  0x7d   :  { %45 = vst [vmem:[%s83_s1 + $0x18] sm:$0xff] %v37_v12  ;;  %41 = vst [vmem:[%s83_s1 + $0x8] sm:$0xff] %v17_v13 }

// kernel: rfm_block.4
= control target key start
LH: loop header
LB: loop body
LE: loop exit
PB: predicated region body
PF: predicated region fallthrough
CT: control target
= control target key end

     0   :  { %v418_v0 = vmov 0.0   ;;  %vm111_vm0 = vcmask 64512   ;;  %vm419_vm1 = vmmov 0   ;;  %vm192_vm2 = vcmask 1041408   ;;  %s521_s4 = inlined_call_operand.vmem [shape: f32[16,32], index: 4, kind: input, shape index: {}]   ;;  %s522_s3 = inlined_call_operand.vmem [shape: f32[8,32], index: 3, kind: input, shape index: {}]   ;;  %s523_s0 = inlined_call_operand.vmem [shape: f32[8,8], index: 0, kind: input, shape index: {}]   ;;  %s524_s5 = inlined_call_operand.vmem [shape: f32[10,32], index: 5, kind: input, shape index: {}]   ;;  %s525_s1 = inlined_call_operand.vmem [shape: f32[8,16], index: 1, kind: input, shape index: {}]   ;;  %s526_s2 = inlined_call_operand.vmem [shape: f32[8,10], index: 2, kind: input, shape index: {}]   ;;  %s527_s7 = inlined_call_operand.vmem [shape: f32[32,16], index: 7, kind: input, shape index: {}]   ;;  %s528_s6 = inlined_call_operand.vmem [shape: f32[1,32], index: 6, kind: input, shape index: {}]   ;;  %s529_s8 = inlined_call_operand.vmem [shape: f32[1,16], index: 8, kind: input, shape index: {}]   ;;  %s530_s9 = inlined_call_operand.vmem [shape: f32[8,16], index: 9, kind: output, shape index: {}]  }
   0x1   :  { %386 = vmatprep.subr.mxu0 %v418_v0  ;;  %393 = vmatprep.subr.mxu1 %v418_v0  ;;  %v36_v1 = vld [vmem:[%s521_s4 + $0x8] sm:$0xff]  ;;  %v33_v2 = vld [vmem:[%s522_s3] sm:$0xff]  ;;  %vm37_vm3 = vcmask 130048   ;;  %vm188_vm4 = vcmask 80896   ;;  %v279_v9 = vld [vmem:[%s527_s7 + $0x18] sm:$0xff]  ;;  %vm287_vm5 = vcmask 261120  }
   0x2   :  { %v32_v3 = vld [vmem:[%s523_s0] sm:$0xff]  ;;  %387 = vmatpush3.msra.mxu0 %v36_v1  ;;  %394 = vmatpush3.msra.mxu1 %v33_v2  ;;  %v187_v5 = vld [vmem:[%s524_s5 + $0x8] sm:$0x3]  ;;  %v278_v10 = vld [vmem:[%s527_s7 + $0x10] sm:$0xff] }
   0x3   :  { %v35_v4 = vld [vmem:[%s521_s4] sm:$0xff]  ;;  %395 = vmatprep.mubr.msk.f32.mxu1 %vm419_vm1, %v418_v0  ;;  %388 = vmatprep.subr.mxu0 %v418_v0  ;;  %v277_v11 = vld [vmem:[%s527_s7 + $0x8] sm:$0xff] }
   0x4   :  { %v34_v6 = vld [vmem:[%s525_s1] sm:$0xff]  ;;  %396 = vmatmul.mubr.msk.f32.vlgmr.msra.gmra.mxu1 %vm111_vm0, %v32_v3  ;;  %398 = vmatprep.subr.mxu1 %v418_v0 }
   0x5   :  { %389 = vmatpush3.msra.mxu0 %v35_v4  ;;  %390 = vmatprep.mubr.msk.f32.mxu0 %vm419_vm1, %v418_v0  ;;  %v186_v7 = vld [vmem:[%s524_s5] sm:$0xff] }
   0x6   :  { %399 = vmatpush3.msk.msra.mxu1 %vm192_vm2, %v187_v5  ;;  %391 = vmatmul.mubr.msk.f32.vlgmr.msra.gmra.mxu0 %vm37_vm3, %v34_v6  ;;  %v185_v8 = vld [vmem:[%s526_s2] sm:$0xff] }
   0x7   :  { %400 = vmatprep.subr.mxu1 %v418_v0  ;;  %402 = vmatprep.mubr.msk.f32.mxu1 %vm419_vm1, %v418_v0  ;;  %v276_v12 = vld [vmem:[%s527_s7] sm:$0xff] }
   0x8   :  { %401 = vmatpush3.msra.mxu1 %v186_v7  ;;  %405 = vmatprep.subr.mxu0 %v418_v0  ;;  %v370_v19 = vld [vmem:[%s528_s6] ss:$0 sm:$0xff] }
   0x9   :  { %403 = vmatmul.mubr.msk.f32.vlgmr.msra.gmra.mxu1 %vm188_vm4, %v185_v8  ;;  %413 = vmatprep.mubr.msk.f32.mxu0 %vm419_vm1, %v418_v0  ;;  %v371_v24 = vld [vmem:[%s529_s8] ss:$0 sm:$0xff] }
   0xa   :  { %406 = vmatpush3.msra.mxu0 %v279_v9 }
   0xb   :  { %407 = vmatprep.subr.mxu0 %v418_v0 }
   0xc   :  { %408 = vmatpush3.msra.mxu0 %v278_v10 }
   0xd   :  { %409 = vmatprep.subr.mxu0 %v418_v0 }
   0xe   :  { %410 = vmatpush3.msra.mxu0 %v277_v11 }
   0xf   :  { %411 = vmatprep.subr.mxu0 %v418_v0 }
  0x10   :  { %412 = vmatpush3.msra.mxu0 %v276_v12 }
  0xc4   :  { %v181_v13 = vpop.f32.mrf.mxu1 }
  0xc6   :  { %v107_v14 = vpop.f32.mrf.mxu0  ;;  %v397_v15 = vpop.f32.mrf.mxu1 }
  0xc7   :  { %v182_v16 = vadd.f32 %v181_v13, %v107_v14 }
  0xc8   :  { %v392_v17 = vpop.f32.mrf.mxu0 }
  0xc9   :  { %v262_v18 = vpop.f32.mrf.mxu1 }
  0xca   :  { %v266_v20 = vadd.f32 %v262_v18, %v182_v16 }
  0xcb   :  { %v404_v21 = vpop.f32.mrf.mxu1 }
  0xcc   :  { %v274_v22 = vadd.f32 %v370_v19, %v266_v20 }
  0xce   :  { %v275_v23 = vmax.f32 %v274_v22, 0.0 }
  0xd0   :  { %414 = vmatmul.mubr.msk.f32.vlgmr.msra.gmra.mxu0 %vm287_vm5, %v275_v23 }
 0x190   :  { %v357_v25 = vpop.f32.mrf.mxu0 }
 0x191   :  { %v358_v26 = vadd.f32 %v371_v24, %v357_v25 }
 0x192   :  { %v415_v27 = vpop.f32.mrf.mxu0 }
 0x193   :  { %361 = vst.msk [vmem:[%s530_s9] sm:$0xff] %vm37_vm3, %v358_v26 }

// kernel: rfm_block.3
= control target key start
LH: loop header
LB: loop body
LE: loop exit
PB: predicated region body
PF: predicated region fallthrough
CT: control target
= control target key end

     0   :  { %s1584_s17 = smov 0   ;;  %s1586_s18 = smov 0   ;;  %s1717_s0 = inlined_call_operand.vmem [shape: f32[24,6], index: 0, kind: input, shape index: {}]   ;;  %s1718_s1 = inlined_call_operand.vmem [shape: f32[24,8], index: 1, kind: input, shape index: {}]   ;;  %s1719_s2 = inlined_call_operand.vmem [shape: f32[24,8], index: 2, kind: input, shape index: {}]   ;;  %s1720_s3 = inlined_call_operand.vmem [shape: f32[24,10], index: 3, kind: input, shape index: {}]   ;;  %s1721_s4 = inlined_call_operand.vmem [shape: f32[6,32], index: 4, kind: input, shape index: {}]   ;;  %s1722_s5 = inlined_call_operand.vmem [shape: f32[8,32], index: 5, kind: input, shape index: {}]   ;;  %s1723_s6 = inlined_call_operand.vmem [shape: f32[8,32], index: 6, kind: input, shape index: {}]   ;;  %s1724_s7 = inlined_call_operand.vmem [shape: f32[10,32], index: 7, kind: input, shape index: {}]   ;;  %s1725_s8 = inlined_call_operand.vmem [shape: f32[1,32], index: 8, kind: input, shape index: {}]   ;;  %s1726_s9 = inlined_call_operand.vmem [shape: f32[32,16], index: 9, kind: input, shape index: {}]   ;;  %s1727_s10 = inlined_call_operand.vmem [shape: f32[1,16], index: 10, kind: input, shape index: {}]   ;;  %s1728_s11 = inlined_call_operand.vmem [shape: f32[24,16], index: 11, kind: output, shape index: {}]  }
   0x1   :  { %s1588_s19 = smov 0  }
   0x2 LB: > { %s1597_s20 = sadd.s32 4294967295, %s1490_s19   ;;  %s1599_s21 = sadd.s32 1, %s1490_s19   ;;  %s1490_s19 = sphi %s1588_s19, %s1732_s19   ;;  %s1486_s18 = sphi %s1586_s18, %s1731_s18   ;;  %s1482_s17 = sphi %s1584_s17, %s1730_s17  }
   0x3   : > { %s276_s22 = ssub.s32 %s1490_s19, %s1599_s21  ;;  %s279_s23 = sadd.s32 1, %s1486_s18 }
   0x4   : > { %p277_p0 = scmp.eq.s32.totalorder %s276_s22, 0  ;;  %p289_p1 = scmp.ne.s32.totalorder %s1486_s18, %s1482_s17 }
   0x5   : > { %p290_p2 = scmp.eq.s32.totalorder %s1597_s20, 1  ;;  %p1252_p3 = scmp.ge.s32.totalorder %s1490_s19, 1 }
   0x6   : > { %s1607_s24 = scalar_select %p277_p0, %s1486_s18, %s279_s23  }
   0x7   : > { %p1609_p4 = por %p290_p2, %p289_p1  ;;  %p403_p5 = scmp.lt.s32.totalorder %s1490_s19, 3 }
   0x9   : > { %p404_p6 = pnand %p1252_p3, %p403_p5 }
   0xa   : > { %s1617_s28 = sshll.u32 (!%p404_p6), %s1597_s20, 1 }
   0xb   : > { %407 = sbr.rel (%p404_p6) target bundleno = 469 (0x1d5), region = 64  ;;  %p478_p7 = scmp.lt.s32.totalorder (!%p404_p6), %s1617_s28, 2 }
  0x10   : > { %v539_v0 = vld [vmem:[%s1722_s5] sm:$0xff]  ;;  %vm629_vm0 = vcmask 1045504   ;;  %s479_s14 = scalar_select %p478_p7, %s1617_s28, 2  ;;  %vm540_vm1 = vcmask 64512   ;;  %vm622_vm2 = vcmask 48128   ;;  %vm805_vm3 = vcmask 1041408  }
  0x11   : > { %v536_v1 = vld [vmem:[%s1721_s4] sm:$0x3f]  ;;  %1315 = vmatprep.subr.mxu1 %v539_v0  ;;  %v797_v8 = vld [vmem:[%s1724_s7 + $0x8] sm:$0x3]  ;;  %vm798_vm4 = vcmask 80896   ;;  %v900_v13 = vld [vmem:[%s1726_s9 + $0x18] sm:$0xff] }
  0x12   : > { %v710_v2 = vld [vmem:[%s1723_s6] sm:$0xff]  ;;  %1316 = vmatpush3.msra.mxu1 %v539_v0  ;;  %s1255_s15 = sshll.u32 %s479_s14, 3  ;;  %v899_v14 = vld [vmem:[%s1726_s9 + $0x10] sm:$0xff]  ;;  %v898_v15 = vld [vmem:[%s1726_s9 + $0x8] sm:$0xff]  ;;  %vm908_vm5 = vcmask 261120   ;;  %vm990_vm6 = vcmask 130048  }
  0x13   : > { %1325 = vmatprep.subr.mxu0 %v710_v2  ;;  %1320 = vmatprep.subr.msk.mxu1 %vm629_vm0, %v536_v1  ;;  %s495_s22 = scalar_lea.vmem %s1718_s1, %s1255_s15  ;;  %s481_s27 = scalar_lea.vmem %s1717_s0, %s1255_s15  ;;  %v796_v11 = vld [vmem:[%s1724_s7] sm:$0xff] }
  0x14   : > { %1326 = vmatpush3.msra.mxu0 %v710_v2  ;;  %v537_v3 = vld [vmem:[%s495_s22] sm:$0xff]  ;;  %v538_v4 = vld [vmem:[%s495_s22 + $0x8] sm:$0xff]  ;;  %s509_s12 = scalar_lea.vmem %s1719_s2, %s1255_s15  ;;  %s523_s23 = scalar_lea.vmem %s1720_s3, %s1255_s15 }
  0x15   : > { %v534_v5 = vld [vmem:[%s481_s27] sm:$0xff]  ;;  %1317 = vmatprep.mubr.msk.f32.mxu1 %vm540_vm1, %v537_v3  ;;  %v709_v7 = vld [vmem:[%s509_s12 + $0x8] sm:$0xff]  ;;  %1337 = vmatprep.subr.mxu0 %v900_v13  ;;  %s470_s22 = sand.u32 1, %s1482_s17   ;;  %s1001_s17 = ssub.s32 (%p1609_p4), 3, %s1617_s28 }
  0x16   : > { %v708_v6 = vld [vmem:[%s509_s12] sm:$0xff]  ;;  %1318 = vmatmul.mubr.msk.f32.vlgmr.msra.gmra.mxu1 %vm540_vm1, %v538_v4  ;;  %v535_v9 = vld [vmem:[%s481_s27 + $0x8] sm:$0xff]  ;;  %s1253_s26 = sshll.u32 %s470_s22, 4  ;;  %s1293_s30 = sshll.u32 (%p1609_p4), %s1597_s20, 4 }
  0x17   : > { %1327 = vmatprep.mubr.msk.f32.mxu0 %vm540_vm1, %v708_v6  ;;  %1321 = vmatpush3.msk.msra.mxu1 %vm629_vm0, %v536_v1  ;;  %v794_v10 = vld [vmem:[%s523_s23] sm:$0xff]  ;;  %v795_v12 = vld [vmem:[%s523_s23 + $0x8] sm:$0xff]  ;;  %s1672_s29 = scalar_lea.vmem [#allocation2], %s1253_s26   ;;  %p1002_p8 = scmp.lt.s32.totalorder (%p1609_p4), %s1001_s17, 2 }
  0x18   : > { %1322 = vmatprep.mubr.msk.f32.mxu1 %vm622_vm2, %v534_v5  ;;  %1330 = vmatprep.subr.msk.mxu1 %vm805_vm3, %v797_v8  ;;  %v897_v16 = vld [vmem:[%s1726_s9] sm:$0xff]  ;;  %s1683_s14 = scalar_lea.vmem (%p1609_p4), %s1728_s11, %s1293_s30  }
  0x19   : > { %1328 = vmatmul.mubr.msk.f32.vlgmr.msra.gmra.mxu0 %vm540_vm1, %v709_v7  ;;  %v1272_v29 = vld [vmem:[%s1725_s8] ss:$0 sm:$0xff] }
  0x1a   : > { %1323 = vmatmul.mubr.msk.f32.vlgmr.msra.gmra.mxu1 %vm622_vm2, %v535_v9  ;;  %1338 = vmatpush3.msra.mxu0 %v900_v13  ;;  %v1273_v36 = vld [vmem:[%s1727_s10] ss:$0 sm:$0xff] }
  0x1b   : > { %1331 = vmatpush3.msk.msra.mxu1 %vm805_vm3, %v797_v8  ;;  %1334 = vmatprep.mubr.msk.f32.mxu1 %vm798_vm4, %v794_v10 }
  0x1c   : > { %1332 = vmatprep.subr.mxu1 %v796_v11  ;;  %1339 = vmatprep.subr.mxu0 %v899_v14 }
  0x1d   : > { %1333 = vmatpush3.msra.mxu1 %v796_v11  ;;  %1340 = vmatpush3.msra.mxu0 %v899_v14 }
  0x1e   : > { %1335 = vmatmul.mubr.msk.f32.vlgmr.msra.gmra.mxu1 %vm798_vm4, %v795_v12  ;;  %1341 = vmatprep.subr.mxu0 %v898_v15 }
  0x1f   : > { %1342 = vmatpush3.msra.mxu0 %v898_v15 }
  0x20   : > { %1343 = vmatprep.subr.mxu0 %v897_v16 }
  0x21   : > { %1344 = vmatpush3.msra.mxu0 %v897_v16 }
  0xd6   : > { %v1319_v17 = vpop.f32.mrf.mxu1 }
  0xd8   : > { %v613_v18 = vpop.f32.mrf.mxu1 }
  0xd9   : > { %v1329_v20 = vpop.f32.mrf.mxu0 }
  0xda   : > { %v1324_v19 = vpop.f32.mrf.mxu1 }
  0xdb   : > { %v705_v21 = vadd.f32 %v1324_v19, %v1319_v17  ;;  %v783_v25 = vpop.f32.mrf.mxu0 }
  0xdc   : > { %v699_v22 = vpop.f32.mrf.mxu1 }
  0xdd   : > { %v793_v23 = vadd.f32 %v1329_v20, %v705_v21  ;;  %v700_v24 = vadd.f32 %v699_v22, %v613_v18 }
  0xde   : > { %v1336_v26 = vpop.f32.mrf.mxu1 }
  0xdf   : > { %v792_v27 = vadd.f32 %v783_v25, %v700_v24  ;;  %v885_v28 = vadd.f32 %v1336_v26, %v793_v23 }
  0xe0   : > { %v875_v30 = vpop.f32.mrf.mxu1 }
  0xe1   : > { %v884_v31 = vadd.f32 %v875_v30, %v792_v27  ;;  %v894_v32 = vadd.f32 %v1272_v29, %v885_v28 }
  0xe3   : > { %v893_v33 = vadd.f32 %v1272_v29, %v884_v31  ;;  %v896_v35 = vmax.f32 %v894_v32, 0.0 }
  0xe5   : > { %v895_v34 = vmax.f32 %v893_v33, 0.0 }
  0xe7   : > { %1345 = vmatprep.mubr.msk.f32.mxu0 %vm908_vm5, %v895_v34 }
  0xe8   : > { %1346 = vmatmul.mubr.msk.f32.vlgmr.msra.gmra.mxu0 %vm908_vm5, %v896_v35 }
 0x1a8   : > { %v1347_v37 = vpop.f32.mrf.mxu0 }
 0x1a9   : > { %v987_v38 = vadd.f32 %v1347_v37, %v1273_v36  ;;  %999 = sbr.rel (!%p1609_p4) target bundleno = 469 (0x1d5), region = 68 }
 0x1aa   : > { %v981_v39 = vpop.f32.mrf.mxu0 }
 0x1ab   : > { %992 = vst.msk [vmem:[%s1672_s29 + $0x8] sm:$0xff] %vm990_vm6, %v987_v38  ;;  %v982_v40 = vadd.f32 %v1273_v36, %v981_v39 }
 0x1ad   : > { %991 = vst.msk [vmem:[%s1672_s29] sm:$0xff] %vm990_vm6, %v982_v40 }
 0x1ae   : > { %s1734_s17 = smov (!%p1002_p8, %s1001_s17), 2 }
 0x1af   : > { %s1278_s16 = sshll.u32 %s1734_s17, 7 }
 0x1b0   : > { %p1281_p9 = scmp.eq.s32.totalorder %s1278_s16, 0 }
 0x1b1   : > { %s1689_s19 = sshrl.u32 (!%p1281_p9), %s1734_s17, 1 }
 0x1b2   : > { %1010 = sbr.rel (%p1281_p9) target bundleno = 469 (0x1d5), region = 72  ;;  %p1282_p10 = scmp.le.s32.totalorder (!%p1281_p9), %s1689_s19, 0 }
 0x1b7   : > { %1187 = sbr.rel (%p1282_p10) target bundleno = 452 (0x1c4), region = 157  ;;  %s1492_s20 = smov (!%p1282_p10), %s1683_s14  }
 0x1b8   : > { %s1496_s25 = smov (!%p1282_p10), %s1672_s29   ;;  %s1500_s28 = smov (!%p1282_p10), 0  }
 0x1b9   : > { %s1504_s23 = smov (!%p1282_p10), 0  }
 0x1bc LB: >> { %v1075_v41 = vld [vmem:[%s1498_s25] sm:$0xff]  ;;  %v1077_v42 = vld [vmem:[%s1498_s25 + $0x8] sm:$0xff]  ;;  %s1079_s22 = sadd.s32 1, %s1502_s28  ;;  %s1069_s23 = sadd.s32 1, %s1506_s23   ;;  %s1506_s23 = sphi %s1504_s23, %s1069_s23   ;;  %s1502_s28 = sphi %s1500_s28, %s1501_s28   ;;  %s1498_s25 = sphi %s1496_s25, %s1084_s25   ;;  %s1494_s20 = sphi %s1492_s20, %s1085_s20  }
 0x1bd   : >> { %1076 = vst [vmem:[%s1494_s20] sm:$0xff] %v1075_v41  ;;  %1078 = vst [vmem:[%s1494_s20 + $0x8] sm:$0xff] %v1077_v42  ;;  %p1080_p11 = scmp.ge.s32.totalorder %s1079_s22, %s1689_s19  ;;  %p1068_p12 = scmp.ge.s32.totalorder %s1069_s23, %s1689_s19 }
 0x1bf   : >> { %s1736_s22 = smov (%p1080_p11, %s1079_s22), 0  ;;  %1071 = sbr.rel (!%p1068_p12) target bundleno = 444 (0x1bc), region = 163 }
 0x1c0   : >> { %s1283_s26 = sshll.u32 %s1736_s22, 4  ;;  %s1501_s28 = smov %s1736_s22  }
 0x1c1   : >> { %s1084_s25 = scalar_lea.vmem %s1672_s29, %s1283_s26 [#allocation2]   ;;  %s1085_s20 = scalar_lea.vmem %s1683_s14, %s1283_s26  }
 0x1c4 PF: > { %s1699_s15 = sand.u32 1, %s1734_s17   ;;  %s1294_s27 = sshll.u32 %s1689_s19, 4 }
 0x1c5   : > { %s1090_s30 = scalar_lea.vmem %s1672_s29, %s1294_s27 [#allocation2]   ;;  %s1092_s12 = scalar_lea.vmem %s1683_s14, %s1294_s27  }
 0x1c6   : > { %p1288_p13 = scmp.le.s32.totalorder %s1699_s15, 0 }
 0x1c7   : > { %s1508_s13 = smov (!%p1288_p13), %s1092_s12   ;;  %s1512_s16 = smov (!%p1288_p13), %s1090_s30  }
 0x1c8   : > { %1201 = sbr.rel (%p1288_p13) target bundleno = 469 (0x1d5), region = 168  ;;  %s1516_s20 = smov (!%p1288_p13), 0  }
 0x1c9   : > { %s1520_s25 = smov (!%p1288_p13), 0  }
 0x1cd LB: >> { %v1102_v43 = vld [vmem:[%s1514_s16] sm:$0xff]  ;;  %s1104_s17 = sadd.s32 1, %s1518_s20  ;;  %s1096_s25 = sadd.s32 1, %s1522_s25   ;;  %s1522_s25 = sphi %s1520_s25, %s1096_s25   ;;  %s1518_s20 = sphi %s1516_s20, %s1517_s20   ;;  %s1514_s16 = sphi %s1512_s16, %s1109_s16   ;;  %s1510_s13 = sphi %s1508_s13, %s1110_s13  }
 0x1ce   : >> { %1103 = vst [vmem:[%s1510_s13] sm:$0xff] %v1102_v43  ;;  %p1105_p0 = scmp.ge.s32.totalorder %s1104_s17, %s1699_s15  ;;  %p1095_p1 = scmp.ge.s32.totalorder %s1096_s25, %s1699_s15 }
 0x1d0   : >> { %s1738_s17 = smov (%p1105_p0, %s1104_s17), 0  ;;  %1098 = sbr.rel (!%p1095_p1) target bundleno = 461 (0x1cd), region = 174 }
 0x1d1   : >> { %s1289_s29 = sshll.u32 %s1738_s17, 3  ;;  %s1517_s20 = smov %s1738_s17  }
 0x1d2   : >> { %s1109_s16 = scalar_lea.vmem %s1090_s30, %s1289_s29 [#allocation2]   ;;  %s1110_s13 = scalar_lea.vmem %s1092_s12, %s1289_s29  }
 0x1d5 PF: > { %p18_p2 = scmp.ge.s32.totalorder %s1599_s21, 4   ;;  %s1730_s17 = smov %s1486_s18 }
 0x1d6   : > { %s1731_s18 = smov %s1607_s24  ;;  %s1732_s19 = smov %s1599_s21 }
 0x1d7   :  { %20 = sbr.rel (!%p18_p2) target bundleno = 2 (0x2), region = 185 }

// kernel: rfm_block.5
= control target key start
LH: loop header
LB: loop body
LE: loop exit
PB: predicated region body
PF: predicated region fallthrough
CT: control target
= control target key end

     0   :  { %v456_v2 = vmov 0.0   ;;  %vm39_vm0 = vcmask 130048   ;;  %vm457_vm1 = vmmov 0   ;;  %s563_s0 = inlined_call_operand.vmem [shape: f32[2,16], index: 0, kind: input, shape index: {}]   ;;  %s564_s1 = inlined_call_operand.vmem [shape: f32[2,16], index: 1, kind: input, shape index: {}]   ;;  %s565_s2 = inlined_call_operand.vmem [shape: f32[2,10], index: 2, kind: input, shape index: {}]   ;;  %s566_s3 = inlined_call_operand.vmem [shape: f32[16,32], index: 3, kind: input, shape index: {}]   ;;  %s567_s4 = inlined_call_operand.vmem [shape: f32[16,32], index: 4, kind: input, shape index: {}]   ;;  %s568_s5 = inlined_call_operand.vmem [shape: f32[10,32], index: 5, kind: input, shape index: {}]   ;;  %s569_s6 = inlined_call_operand.vmem [shape: f32[1,32], index: 6, kind: input, shape index: {}]   ;;  %s570_s7 = inlined_call_operand.vmem [shape: f32[32,16], index: 7, kind: input, shape index: {}]   ;;  %s571_s8 = inlined_call_operand.vmem [shape: f32[1,16], index: 8, kind: input, shape index: {}]   ;;  %s572_s9 = inlined_call_operand.hbm [shape: f32[2,16], index: 9, kind: output, shape index: {}]  }
   0x1   :  { %v38_v0 = vld [vmem:[%s567_s4 + $0x8] sm:$0xff]  ;;  %399 = vmatprep.subr.mxu0 %v456_v2  ;;  %406 = vmatprep.subr.mxu1 %v456_v2  ;;  %v37_v3 = vld [vmem:[%s567_s4] sm:$0xff] }
   0x2   :  { %v35_v1 = vld [vmem:[%s566_s3 + $0x8] sm:$0xff]  ;;  %400 = vmatpush3.msra.mxu0 %v38_v0  ;;  %v36_v4 = vld [vmem:[%s564_s1] sm:$0x3]  ;;  %403 = vmatprep.mubr.msk.f32.mxu0 %vm457_vm1, %v456_v2 }
   0x3   :  { %407 = vmatpush3.msra.mxu1 %v35_v1  ;;  %v34_v5 = vld [vmem:[%s566_s3] sm:$0xff]  ;;  %401 = vmatprep.subr.mxu0 %v456_v2 }
   0x4   :  { %14 = vsyncpa [#allocation3], 0  ;;  %402 = vmatpush3.msra.mxu0 %v37_v3  ;;  %408 = vmatprep.subr.mxu1 %v456_v2  ;;  %v33_v6 = vld [vmem:[%s563_s0] sm:$0x3]  ;;  %v188_v7 = vld [vmem:[%s568_s5 + $0x8] sm:$0x3] }
   0x5   :  { %vm193_vm2 = vcmask 1041408   ;;  %404 = vmatmul.mubr.msk.f32.vlgmr.msra.gmra.mxu0 %vm39_vm0, %v36_v4  ;;  %409 = vmatpush3.msra.mxu1 %v34_v5  ;;  %v187_v8 = vld [vmem:[%s568_s5] sm:$0xff]  ;;  %vm189_vm3 = vcmask 80896   ;;  %v280_v10 = vld [vmem:[%s570_s7 + $0x18] sm:$0xff]  ;;  %v279_v11 = vld [vmem:[%s570_s7 + $0x10] sm:$0xff]  ;;  %vm288_vm4 = vcmask 261120  }
   0x6   :  { %410 = vmatprep.mubr.msk.f32.mxu1 %vm457_vm1, %v456_v2  ;;  %413 = vmatprep.subr.mxu0 %v456_v2  ;;  %v186_v9 = vld [vmem:[%s565_s2] sm:$0x3]  ;;  %v278_v12 = vld [vmem:[%s570_s7 + $0x8] sm:$0xff]  ;;  %s458_s11 = smov [#allocation2]   ;;  %vm362_vm5 = vcmask 123904  }
   0x7   :  { %411 = vmatmul.mubr.msk.f32.vlgmr.msra.gmra.mxu1 %vm39_vm0, %v33_v6  ;;  %414 = vmatpush3.msk.msra.mxu0 %vm193_vm2, %v188_v7  ;;  %v277_v13 = vld [vmem:[%s570_s7] sm:$0xff]  ;;  %s370_s12 = sshll.u32 %s458_s11, 4  ;;  %s371_s12 = int_to_ptr.vmem [resolvable:$true] %s370_s12 }
   0x8   :  { %415 = vmatprep.subr.mxu0 %v456_v2  ;;  %417 = vmatprep.mubr.msk.f32.mxu0 %vm457_vm1, %v456_v2  ;;  %v382_v20 = vld [vmem:[%s569_s6] ss:$0 sm:$0xff]  ;;  %s434_s13 = scalar_lea.vmem %s371_s12, 32  ;;  %p439_p1 = scmp.lt.s32.totalorder %s371_s12, %s371_s12 }
   0x9   :  { %416 = vmatpush3.msra.mxu0 %v187_v8  ;;  %420 = vmatprep.subr.mxu1 %v456_v2  ;;  %v383_v25 = vld [vmem:[%s571_s8] ss:$0 sm:$0xff]  ;;  %p435_p0 = scmp.ne.s32.totalorder %s371_s12, %s434_s13  ;;  %p440_p2 = scmp.lt.s32.totalorder %s434_s13, %s434_s13 }
   0xa   :  { %418 = vmatmul.mubr.msk.f32.vlgmr.msra.gmra.mxu0 %vm189_vm3, %v186_v9  ;;  %428 = vmatprep.mubr.msk.f32.mxu1 %vm457_vm1, %v456_v2 }
   0xb   :  { %421 = vmatpush3.msra.mxu1 %v280_v10  ;;  %p441_p3 = por %p440_p2, %p439_p1 }
   0xc   :  { %422 = vmatprep.subr.mxu1 %v456_v2 }
   0xd   :  { %423 = vmatpush3.msra.mxu1 %v279_v11  ;;  %p442_p4 = pnand %p441_p3, %p435_p0 }
   0xe   :  { %424 = vmatprep.subr.mxu1 %v456_v2 }
   0xf   :  { %425 = vmatpush3.msra.mxu1 %v278_v12 }
  0x10   :  { %426 = vmatprep.subr.mxu1 %v456_v2 }
  0x11   :  { %427 = vmatpush3.msra.mxu1 %v277_v13 }
  0xc5   :  { %v109_v14 = vpop.f32.mrf.mxu0 }
  0xc7   :  { %v182_v15 = vpop.f32.mrf.mxu1  ;;  %v405_v16 = vpop.f32.mrf.mxu0 }
  0xc8   :  { %v183_v17 = vadd.f32 %v182_v15, %v109_v14 }
  0xc9   :  { %v412_v18 = vpop.f32.mrf.mxu1 }
  0xca   :  { %v263_v19 = vpop.f32.mrf.mxu0 }
  0xcb   :  { %v267_v21 = vadd.f32 %v263_v19, %v183_v17 }
  0xcc   :  { %v419_v22 = vpop.f32.mrf.mxu0 }
  0xcd   :  { %v275_v23 = vadd.f32 %v382_v20, %v267_v21 }
  0xcf   :  { %v276_v24 = vmax.f32 %v275_v23, 0.0 }
  0xd1   :  { %429 = vmatmul.mubr.msk.f32.vlgmr.msra.gmra.mxu1 %vm288_vm4, %v276_v24 }
 0x191   :  { %v358_v26 = vpop.f32.mrf.mxu1 }
 0x192   :  { %v359_v27 = vadd.f32 %v383_v25, %v358_v26 }
 0x193   :  { %v430_v28 = vpop.f32.mrf.mxu1 }
 0x194   :  { %363 = vst.msk [vmem:[#allocation2] sm:$0x3] %vm362_vm5, %v359_v27 }
 0x195   :  { %445 = shalt.err (!%p442_p4)
}
 0x196   :  { %373 = dma.vmem_to_hbm [thread:$0]  %s371_s12, 32, %s572_s9, [#allocation3]  }
 0x197   :  { %454 = dma.done.wait [#allocation3], 32  }
 0x198   :  { %455 = vsyncadd [#allocation3], 4294967264 }
 0x199   :  { %377 = vsyncpa [#allocation3], 1 }

</bundles_post_ra>
